<compile_context>
chip_gen: v7x
topology: tpu7x:2x2x1
jax: 0.10.0
libtpu: 0.0.40
codegen_flags: <defaults>
</compile_context>

<pallas_src>
import functools

import numpy as np

import jax
import jax.numpy as jnp
from jax.experimental import pallas as pl
from jax.experimental.pallas import tpu as pltpu


def _round_up(x, m):
    return ((x + m - 1) // m) * m


def _gelu(h, approximate):
    if approximate:
        # tanh form -> EUP (separate VLIW slot, essentially free under the MXU).
        c = 0.7978845608028654  # sqrt(2/pi)
        return 0.5 * h * (1.0 + jnp.tanh(c * (h + 0.044715 * h * h * h)))
    # Exact erf GELU, matching torch.nn.GELU default.
    return 0.5 * h * (1.0 + jax.lax.erf(h * 0.7071067811865476))


def _vmem_budget_bytes():
    """Usable VMEM budget, gated on the chip's physical VMEM capacity."""
    cap = None
    try:
        info = pltpu.get_tpu_info()
        for name in ("vmem_capacity_bytes", "vmem_bytes", "vmem_size_bytes"):
            v = getattr(info, name, None)
            if isinstance(v, int) and v > 0:
                cap = v
                break
    except Exception:
        cap = None
    if cap is None:
        cap = 64 * 1024 * 1024  # conservative default (v7x-sized)
    if cap >= 100 * 1024 * 1024:
        return 96 * 1024 * 1024      # v5e / v6e: 128 MiB physical
    return 52 * 1024 * 1024          # v7x: 64 MiB physical, leave Mosaic headroom


# ----------------------------------------------------------------------------
# Kernels
# ----------------------------------------------------------------------------

def _mlp_kernel_fused(x_ref, w1_ref, b1_ref, w2_ref, b2_ref, o_ref, *,
                      approximate):
    """Collapsed-H path: full hidden dim resident, single fused matmul chain."""
    h = jnp.dot(x_ref[...], w1_ref[...], preferred_element_type=jnp.float32)
    h = h + b1_ref[...]
    h = _gelu(h, approximate)
    out = jnp.dot(h.astype(w2_ref.dtype), w2_ref[...],
                  preferred_element_type=jnp.float32)
    o_ref[...] = (out + b2_ref[...]).astype(o_ref.dtype)


def _mlp_kernel_htiled(x_ref, w1_ref, b1_ref, w2_ref, b2_ref, o_ref, acc_ref, *,
                       approximate):
    """H-tiled path: grid = (M tiles, H tiles); the H axis is the fc2
    contraction -> accumulate into an f32 VMEM scratch, write output on the
    last H step. j==0 writes the partial directly (no zero-fill)."""
    j = pl.program_id(1)

    h = jnp.dot(x_ref[...], w1_ref[...], preferred_element_type=jnp.float32)
    h = h + b1_ref[...]
    h = _gelu(h, approximate)
    fc2_partial = jnp.dot(h.astype(w2_ref.dtype), w2_ref[...],
                          preferred_element_type=jnp.float32)

    @pl.when(j == 0)
    def _():
        acc_ref[...] = fc2_partial

    @pl.when(j > 0)
    def _():
        acc_ref[...] += fc2_partial

    @pl.when(j == pl.num_programs(1) - 1)
    def _():
        o_ref[...] = (acc_ref[...] + b2_ref[...]).astype(o_ref.dtype)


# ----------------------------------------------------------------------------
# Wrapper: parameters are padded / cast ONCE at construction (hoisted out of
# the forward path); __call__ only pads the activation rows.
# ----------------------------------------------------------------------------

class PallasMlp:
    def __init__(self, w1, b1, w2, b2, *, mxu_dtype=jnp.bfloat16,
                 tm=512, th=512, approximate_gelu=False, force_h_tiling=False):
        """w1: (C, H); b1: (H,); w2: (H, O); b2: (O,).

        mxu_dtype: dtype of the MXU operands (bf16 default = native MXU rate on
        all generations; bias add, GELU and accumulation stay f32).
        """
        C, H = w1.shape
        H2, O = w2.shape
        assert H2 == H, "fc1/fc2 hidden dims must match"
        self.C, self.H, self.O = C, H, O
        self.cdtype = np.dtype(mxu_dtype)
        self.approximate = bool(approximate_gelu)

        itm = self.cdtype.itemsize
        out_itm = 4  # budget assuming f32 output (worst case)
        budget = _vmem_budget_bytes()
        self.budget = budget

        Op = _round_up(O, 128)
        Hp_full = _round_up(H, 128)
        tm = max(8, _round_up(int(tm), 8))

        def ws(tm_, th_, tiled):
            # Double-buffered pipeline tiles + GELU intermediate (+ cast copy)
            # + f32 accumulator (tiled path only).
            in_bufs = (tm_ * C * itm + C * th_ * itm + 8 * th_ * 4
                       + th_ * Op * itm + 8 * Op * 4)
            out_bufs = tm_ * Op * out_itm
            b = 2 * (in_bufs + out_bufs)
            b += tm_ * th_ * 4 + tm_ * th_ * itm
            if tiled:
                b += tm_ * Op * 4
            return b

        collapse = (not force_h_tiling) and ws(tm, Hp_full, False) <= budget
        if collapse:
            th = Hp_full
            Hp = Hp_full
            tiled = False
        else:
            # H-tiled: th multiple of 256 (full-width passes on the 256-wide MXU).
            th = max(256, min(_round_up(int(th), 256), _round_up(H, 256)))
            while ws(tm, th, True) > budget and th > 256:
                th = max(256, th // 2)
            while ws(tm, th, True) > budget and tm > 256:
                tm = max(256, _round_up(tm // 2, 8))
            Hp = _round_up(H, th)
            tiled = True

        self.tm, self.th, self.Hp, self.Op, self.tiled = tm, th, Hp, Op, tiled
        self._ws = ws

        # Hoisted: pad + cast the static parameters once, not per forward call.
        self.w1p = jnp.pad(jnp.asarray(w1).astype(self.cdtype),
                           ((0, 0), (0, Hp - H)))
        self.b1p = jnp.pad(jnp.asarray(b1).astype(jnp.float32),
                           ((0, Hp - H),)).reshape(1, Hp)
        self.w2p = jnp.pad(jnp.asarray(w2).astype(self.cdtype),
                           ((0, Hp - H), (0, Op - O)))
        self.b2p = jnp.pad(jnp.asarray(b2).astype(jnp.float32),
                           ((0, Op - O),)).reshape(1, Op)

    def __call__(self, x):
        B, N, C = x.shape
        assert C == self.C
        M = B * N
        Hp, Op, th = self.Hp, self.Op, self.th

        tm = max(8, min(self.tm, _round_up(M, 8)))
        Mp = _round_up(M, tm)
        if (not self.tiled) and Mp // tm == 1 and M >= 256:
            # Weights are VMEM-resident (DMA'd once), so splitting the single M
            # tile in two is free and lets v7x megacore use both TensorCores.
            tm = _round_up((M + 1) // 2, 8)
            Mp = _round_up(M, tm)
        grid_m = Mp // tm

        x2d = x.reshape(M, C).astype(self.cdtype)
        if Mp != M:
            x2d = jnp.pad(x2d, ((0, Mp - M), (0, 0)))

        out_dtype = x.dtype
        itm = self.cdtype.itemsize
        out_itm = np.dtype(out_dtype).itemsize

        # Advisory cost: weights re-stream once per M tile when H is grid-tiled,
        # once total when the H grid is collapsed.
        w_reads = grid_m if self.tiled else 1
        flops = 2 * Mp * C * Hp + 2 * Mp * Hp * Op
        bytes_accessed = (Mp * C * itm
                          + w_reads * (C * Hp + Hp * Op) * itm
                          + w_reads * (Hp + Op) * 4
                          + Mp * Op * out_itm)
        cost = pl.CostEstimate(flops=int(flops), transcendentals=int(Mp * Hp),
                               bytes_accessed=int(bytes_accessed))

        vmem_limit = int(min(self.budget,
                             max(32 * 1024 * 1024,
                                 int(1.4 * self._ws(tm, th, self.tiled)))))

        if self.tiled:
            grid = (grid_m, Hp // th)
            kernel = functools.partial(_mlp_kernel_htiled,
                                       approximate=self.approximate)
            in_specs = [
                pl.BlockSpec((tm, C), lambda i, j: (i, 0)),    # x rows
                pl.BlockSpec((C, th), lambda i, j: (0, j)),    # fc1 weight H-tile
                pl.BlockSpec((1, th), lambda i, j: (0, j)),    # fc1 bias H-tile
                pl.BlockSpec((th, Op), lambda i, j: (j, 0)),   # fc2 weight H-tile
                pl.BlockSpec((1, Op), lambda i, j: (0, 0)),    # fc2 bias
            ]
            out_specs = pl.BlockSpec((tm, Op), lambda i, j: (i, 0))
            scratch = [pltpu.VMEM((tm, Op), jnp.float32)]
            semantics = ("parallel", "arbitrary")
        else:
            grid = (grid_m,)
            kernel = functools.partial(_mlp_kernel_fused,
                                       approximate=self.approximate)
            in_specs = [
                pl.BlockSpec((tm, C), lambda i: (i, 0)),   # x rows
                pl.BlockSpec((C, Hp), lambda i: (0, 0)),   # fc1 weight (resident)
                pl.BlockSpec((1, Hp), lambda i: (0, 0)),   # fc1 bias
                pl.BlockSpec((Hp, Op), lambda i: (0, 0)),  # fc2 weight (resident)
                pl.BlockSpec((1, Op), lambda i: (0, 0)),   # fc2 bias
            ]
            out_specs = pl.BlockSpec((tm, Op), lambda i: (i, 0))
            scratch = []
            semantics = ("parallel",)

        out2d = pl.pallas_call(
            kernel,
            out_shape=jax.ShapeDtypeStruct((Mp, Op), out_dtype),
            grid_spec=pltpu.PrefetchScalarGridSpec(
                num_scalar_prefetch=0,
                grid=grid,
                in_specs=in_specs,
                out_specs=out_specs,
                scratch_shapes=scratch,
            ),
            compiler_params=pltpu.CompilerParams(
                dimension_semantics=semantics,
                vmem_limit_bytes=vmem_limit,
            ),
            cost_estimate=cost,
        )(x2d, self.w1p, self.b1p, self.w2p, self.b2p)

        return out2d[:M, :self.O].reshape(B, N, self.O)


def reference_mlp(x, w1, b1, w2, b2):
    h = x @ w1 + b1
    h = 0.5 * h * (1.0 + jax.lax.erf(h / jnp.sqrt(2.0)))
    return h @ w2 + b2


if __name__ == "__main__":
    # Small shapes consistent with the module: CATLayer tokens (B, H*W, C)
    # through the MLP, mlp_ratio=4 -> hidden = 4*dim.
    B = 2
    res = 16                    # input_resolution 16x16 -> N = 256 tokens
    N = res * res
    in_features = 32            # dim
    hidden_features = 4 * in_features
    out_features = in_features

    key = jax.random.PRNGKey(0)
    kx, k1, kb1, k2, kb2 = jax.random.split(key, 5)

    x = jax.random.normal(kx, (B, N, in_features), dtype=jnp.float32)

    # Deterministic parameter init (PyTorch Linear stores (out, in); we keep (in, out)).
    w1 = jax.random.normal(k1, (in_features, hidden_features), dtype=jnp.float32) * 0.05
    b1 = jax.random.normal(kb1, (hidden_features,), dtype=jnp.float32) * 0.01
    w2 = jax.random.normal(k2, (hidden_features, out_features), dtype=jnp.float32) * 0.05
    b2 = jax.random.normal(kb2, (out_features,), dtype=jnp.float32) * 0.01

    ref = reference_mlp(x, w1, b1, w2, b2)

    # 1) f32 MXU path, collapsed H grid: must match the exact reference tightly.
    mlp_f32 = PallasMlp(w1, b1, w2, b2, mxu_dtype=jnp.float32)
    out_f32 = jax.block_until_ready(mlp_f32(x))
    assert out_f32.shape == (B, N, out_features)
    assert not mlp_f32.tiled, "small weights should collapse the H grid"
    assert jnp.allclose(out_f32, ref, atol=1e-4, rtol=1e-4)

    # 2) bf16 MXU path (default; native MXU rate, f32 accumulation): looser tolerance.
    mlp_bf16 = PallasMlp(w1, b1, w2, b2)  # mxu_dtype=jnp.bfloat16 default
    out_bf16 = jax.block_until_ready(mlp_bf16(x))
    assert out_bf16.shape == (B, N, out_features)
    assert jnp.allclose(out_bf16, ref, atol=3e-2, rtol=3e-2)

    # 3) Force the H-tiled accumulator path (multi-step fc2 contraction) to
    #    validate the pl.when init/accumulate/finalize structure.
    hidden_big = 512
    k3, kb3, k4, kb4 = jax.random.split(jax.random.PRNGKey(1), 4)
    w1b = jax.random.normal(k3, (in_features, hidden_big), dtype=jnp.float32) * 0.05
    b1b = jax.random.normal(kb3, (hidden_big,), dtype=jnp.float32) * 0.01
    w2b = jax.random.normal(k4, (hidden_big, out_features), dtype=jnp.float32) * 0.05
    b2b = jax.random.normal(kb4, (out_features,), dtype=jnp.float32) * 0.01
    ref_b = reference_mlp(x, w1b, b1b, w2b, b2b)

    mlp_tiled = PallasMlp(w1b, b1b, w2b, b2b, mxu_dtype=jnp.float32,
                          th=256, force_h_tiling=True)
    assert mlp_tiled.tiled and mlp_tiled.Hp // mlp_tiled.th == 2
    out_tiled = jax.block_until_ready(mlp_tiled(x))
    assert out_tiled.shape == (B, N, out_features)
    assert jnp.allclose(out_tiled, ref_b, atol=1e-4, rtol=1e-4)

    print("KERNEL_OK")
</pallas_src>

<mosaic_0001>
module attributes {stable_mosaic.version = 11 : i64} {
  func.func @_mlp_kernel_fused(%arg0: i32, %arg1: memref<256x32xf32, #tpu.memory_space<vmem>>, %arg2: memref<32x128xf32, #tpu.memory_space<vmem>>, %arg3: memref<1x128xf32, #tpu.memory_space<vmem>>, %arg4: memref<128x128xf32, #tpu.memory_space<vmem>>, %arg5: memref<1x128xf32, #tpu.memory_space<vmem>>, %arg6: memref<256x128xf32, #tpu.memory_space<vmem>>) attributes {dimension_semantics = [#tpu.dimension_semantics<parallel>], iteration_bounds = array<i64: 2>, scalar_prefetch = 0 : i64, scratch_operands = 0 : i64, tpu.core_type = #tpu.core_type<tc>, window_params = [{transform_indices = @transform_0, window_bounds = array<i64: 256, 32>}, {pipeline_mode = #tpu.pipeline_mode<synchronous>, transform_indices = @transform_1, window_bounds = array<i64: 32, 128>}, {pipeline_mode = #tpu.pipeline_mode<synchronous>, transform_indices = @transform_2, window_bounds = array<i64: 1, 128>}, {pipeline_mode = #tpu.pipeline_mode<synchronous>, transform_indices = @transform_3, window_bounds = array<i64: 128, 128>}, {pipeline_mode = #tpu.pipeline_mode<synchronous>, transform_indices = @transform_4, window_bounds = array<i64: 1, 128>}, {transform_indices = @transform_5, window_bounds = array<i64: 256, 128>}]} {
    %c0 = arith.constant 0 : index
    %c0_0 = arith.constant 0 : index
    %0 = vector.load %arg1[%c0, %c0_0] : memref<256x32xf32, #tpu.memory_space<vmem>>, vector<256x32xf32>
    %c0_1 = arith.constant 0 : index
    %c0_2 = arith.constant 0 : index
    %1 = vector.load %arg2[%c0_1, %c0_2] : memref<32x128xf32, #tpu.memory_space<vmem>>, vector<32x128xf32>
    %cst = arith.constant dense<0.000000e+00> : vector<256x128xf32>
    %2 = tpu.matmul %0, %1, %cst {dimension_numbers = #tpu.dot_dimension_numbers<[1], [0], [0], [1], [0, 0, 1, 1], [], []>} : vector<256x32xf32>, vector<32x128xf32>, vector<256x128xf32> -> vector<256x128xf32>
    %c0_3 = arith.constant 0 : index
    %c0_4 = arith.constant 0 : index
    %3 = vector.load %arg3[%c0_3, %c0_4] : memref<1x128xf32, #tpu.memory_space<vmem>>, vector<1x128xf32>
    %4 = vector.broadcast %3 : vector<1x128xf32> to vector<256x128xf32>
    %5 = arith.addf %2, %4 : vector<256x128xf32>
    %cst_5 = arith.constant 5.000000e-01 : f32
    %6 = vector.broadcast %cst_5 : f32 to vector<256x128xf32>
    %7 = arith.mulf %6, %5 : vector<256x128xf32>
    %cst_6 = arith.constant 0.707106769 : f32
    %8 = vector.broadcast %cst_6 : f32 to vector<256x128xf32>
    %9 = arith.mulf %5, %8 : vector<256x128xf32>
    %10 = math.erf %9 : vector<256x128xf32>
    %cst_7 = arith.constant 1.000000e+00 : f32
    %11 = vector.broadcast %cst_7 : f32 to vector<256x128xf32>
    %12 = arith.addf %11, %10 : vector<256x128xf32>
    %13 = arith.mulf %7, %12 : vector<256x128xf32>
    %c0_8 = arith.constant 0 : index
    %c0_9 = arith.constant 0 : index
    %14 = vector.load %arg4[%c0_8, %c0_9] : memref<128x128xf32, #tpu.memory_space<vmem>>, vector<128x128xf32>
    %cst_10 = arith.constant dense<0.000000e+00> : vector<256x128xf32>
    %15 = tpu.matmul %13, %14, %cst_10 {dimension_numbers = #tpu.dot_dimension_numbers<[1], [0], [0], [1], [0, 0, 1, 1], [], []>} : vector<256x128xf32>, vector<128x128xf32>, vector<256x128xf32> -> vector<256x128xf32>
    %c0_11 = arith.constant 0 : index
    %c0_12 = arith.constant 0 : index
    %16 = vector.load %arg5[%c0_11, %c0_12] : memref<1x128xf32, #tpu.memory_space<vmem>>, vector<1x128xf32>
    %17 = vector.broadcast %16 : vector<1x128xf32> to vector<256x128xf32>
    %18 = arith.addf %15, %17 : vector<256x128xf32>
    %c0_13 = arith.constant 0 : index
    %c0_14 = arith.constant 0 : index
    %19 = vector.load %arg6[%c0_13, %c0_14] : memref<256x128xf32, #tpu.memory_space<vmem>>, vector<256x128xf32>
    tpu.vector_store %arg6[%c0_13, %c0_14], %18 {strides = array<i32>} : memref<256x128xf32, #tpu.memory_space<vmem>>, vector<256x128xf32>,
    return
  }
  func.func @transform_0(%arg0: i32) -> (i32, i32) {
    %c0_i32 = arith.constant 0 : i32
    %c0_i32_0 = arith.constant 0 : i32
    return %arg0, %c0_i32 : i32, i32
  }
  func.func @transform_1(%arg0: i32) -> (i32, i32) {
    %c0_i32 = arith.constant 0 : i32
    %c0_i32_0 = arith.constant 0 : i32
    %c0_i32_1 = arith.constant 0 : i32
    return %c0_i32, %c0_i32_0 : i32, i32
  }
  func.func @transform_2(%arg0: i32) -> (i32, i32) {
    %c0_i32 = arith.constant 0 : i32
    %c0_i32_0 = arith.constant 0 : i32
    %c0_i32_1 = arith.constant 0 : i32
    return %c0_i32, %c0_i32_0 : i32, i32
  }
  func.func @transform_3(%arg0: i32) -> (i32, i32) {
    %c0_i32 = arith.constant 0 : i32
    %c0_i32_0 = arith.constant 0 : i32
    %c0_i32_1 = arith.constant 0 : i32
    return %c0_i32, %c0_i32_0 : i32, i32
  }
  func.func @transform_4(%arg0: i32) -> (i32, i32) {
    %c0_i32 = arith.constant 0 : i32
    %c0_i32_0 = arith.constant 0 : i32
    %c0_i32_1 = arith.constant 0 : i32
    return %c0_i32, %c0_i32_0 : i32, i32
  }
  func.func @transform_5(%arg0: i32) -> (i32, i32) {
    %c0_i32 = arith.constant 0 : i32
    %c0_i32_0 = arith.constant 0 : i32
    return %arg0, %c0_i32 : i32, i32
  }
}

</mosaic_0001>

<bundles_post_ra>
// kernel: tpu_custom_call.1
= control target key start
LH: loop header
LB: loop body
LE: loop exit
PB: predicated region body
PF: predicated region fallthrough
CT: control target
= control target key end

     0   :  { %10 = vsyncpa [#allocation3], 0  ;;  %s2053_s0 = inlined_call_operand.vmem [shape: f32[512,32], index: 0, kind: input, shape index: {}]   ;;  %s2054_s1 = inlined_call_operand.vmem [shape: f32[32,128], index: 1, kind: input, shape index: {}]   ;;  %s2055_s2 = inlined_call_operand.vmem [shape: f32[1,128], index: 2, kind: input, shape index: {}]   ;;  %s2056_s3 = inlined_call_operand.vmem [shape: f32[128,128], index: 3, kind: input, shape index: {}]   ;;  %s2057_s4 = inlined_call_operand.vmem [shape: f32[1,128], index: 4, kind: input, shape index: {}]   ;;  %s2058_s5 = inlined_call_operand.hbm [shape: f32[512,128], index: 5, kind: output, shape index: {}]  }
   0x1   :  { %12 = vsyncpa [#allocation3 + $0x1], 0  ;;  %s1632_s18 = smov 0   ;;  %s1634_s19 = smov 0  }
   0x2   :  { %s1636_s20 = smov 0   ;;  %s1638_s21 = smov 0  }
   0x3 LB: > { %s1653_s22 = sadd.s32 4294967295, %s1597_s21   ;;  %s1107_s23 = sadd.s32 4294967294, %s1597_s21   ;;  %s1597_s21 = sphi %s1638_s21, %s2064_s21   ;;  %s1593_s20 = sphi %s1636_s20, %s2063_s20   ;;  %s1589_s19 = sphi %s1634_s19, %s2062_s19   ;;  %s1585_s18 = sphi %s1632_s18, %s2061_s18  }
   0x4   : > { %s1657_s24 = sadd.s32 1, %s1597_s21   ;;  %s135_s25 = sadd.s32 1, %s1593_s20 }
   0x5   : > { %s132_s26 = ssub.s32 %s1597_s21, %s1657_s24  ;;  %p145_p0 = scmp.ne.s32.totalorder %s1593_s20, %s1589_s19 }
   0x6   : > { %p133_p1 = scmp.eq.s32.totalorder %s132_s26, 0  ;;  %p146_p2 = scmp.eq.s32.totalorder %s1653_s22, 1 }
   0x7   : > { %p151_p3 = scmp.ne.s32.totalorder %s1589_s19, %s1585_s18  ;;  %p152_p4 = scmp.eq.s32.totalorder %s1107_s23, 1 }
   0x8   : > { %s1668_s27 = scalar_select %p133_p1, %s1593_s20, %s135_s25  }
   0x9   : > { %p1670_p5 = por %p146_p2, %p145_p0  ;;  %p1674_p6 = por %p152_p4, %p151_p3 }
   0xa   : > { %p1110_p7 = scmp.ge.s32.totalorder %s1597_s21, 1  ;;  %p191_p8 = scmp.lt.s32.totalorder %s1597_s21, 3 }
   0xc   : > { %p192_p9 = pnand %p1110_p7, %p191_p8 }
   0xd   : > { %v258_v0 = vld [vmem:[%s2054_s1] sm:$0xff] (!%p192_p9)  ;;  %v259_v1 = vld [vmem:[%s2054_s1 + $0x8] sm:$0xff] (!%p192_p9)  ;;  %v260_v2 = vld [vmem:[%s2054_s1 + $0x10] sm:$0xff] (!%p192_p9)  ;;  %s1112_s11 = sshll.u32 (!%p192_p9), %s1653_s22, 5  ;;  %vm269_vm0 = vcmask (!%p192_p9), 261120   ;;  %s216_s26 = sand.u32 (!%p192_p9), 1, %s1589_s19  }
   0xe   : > { %195 = sbr.rel (%p192_p9) target bundleno = 549 (0x225), region = 40  ;;  %v1374_v3 = vpack.c.bf16 (!%p192_p9), %v259_v1, %v258_v0  ;;  %v261_v4 = vld [vmem:[%s2054_s1 + $0x18] sm:$0xff] (!%p192_p9)  ;;  %p220_p10 = scmp.lt.s32.totalorder (!%p192_p9), %s1112_s11, 63  ;;  %v751_v5 = vld [vmem:[%s2056_s3] sm:$0xff] (!%p192_p9)  ;;  %v752_v6 = vld [vmem:[%s2056_s3 + $0x8] sm:$0xff] (!%p192_p9) }
   0xf   : > { %v1378_v7 = vpack.c.bf16 (!%p192_p9), %v261_v4, %v260_v2  ;;  %v1382_v8 = vpack.c.bf16 (!%p192_p9), %v752_v6, %v751_v5  ;;  %v753_v9 = vld [vmem:[%s2056_s3 + $0x10] sm:$0xff] (!%p192_p9)  ;;  %v754_v10 = vld [vmem:[%s2056_s3 + $0x18] sm:$0xff] (!%p192_p9)  ;;  %v755_v12 = vld [vmem:[%s2056_s3 + $0x20] sm:$0xff] (!%p192_p9)  ;;  %s1111_s30 = sshll.u32 (!%p192_p9), %s216_s26, 8  ;;  %s1153_s9 = sshll.u32 (!%p192_p9), %s1653_s22, 12 }
  0x10   : > { %1375 = vmatprep.subr.bf16.mxu0 (!%p192_p9), %v1374_v3  ;;  %v1386_v11 = vpack.c.bf16 (!%p192_p9), %v754_v10, %v753_v9  ;;  %v756_v13 = vld [vmem:[%s2056_s3 + $0x28] sm:$0xff] (!%p192_p9)  ;;  %v757_v47 = vld [vmem:[%s2056_s3 + $0x30] sm:$0xff] (!%p192_p9)  ;;  %v758_v48 = vld [vmem:[%s2056_s3 + $0x38] sm:$0xff] (!%p192_p9)  ;;  %s1937_s8 = scalar_lea.vmem (!%p192_p9), [#allocation2], %s1111_s30  ;;  %s2012_s22 = scalar_lea.sflag (!%p192_p9), [#allocation3], %s216_s26 }
  0x11   : > { %1377 = vmatpush3.bf16.msra.mxu0 (!%p192_p9), %v1374_v3  ;;  %1414 = vmatprep.subr.bf16.mxu1 (!%p192_p9), %v1382_v8  ;;  %v1390_v16 = vpack.c.bf16 (!%p192_p9), %v756_v13, %v755_v12  ;;  %v1394_v49 = vpack.c.bf16 (!%p192_p9), %v758_v48, %v757_v47  ;;  %v759_v50 = vld [vmem:[%s2056_s3 + $0x40] sm:$0xff] (!%p192_p9)  ;;  %v760_v51 = vld [vmem:[%s2056_s3 + $0x48] sm:$0xff] (!%p192_p9)  ;;  %v761_v53 = vld [vmem:[%s2056_s3 + $0x50] sm:$0xff] (!%p192_p9)  ;;  %s1045_s10 = sshll.u32 (!%p192_p9), %s1937_s8, 4  ;;  %s1599_s15 = smov (!%p192_p9), [#allocation2]   ;;  %s2005_s10 = int_to_ptr.vmem [resolvable:$true] %s1045_s10 }
  0x12   : > { %1379 = vmatprep.subr.bf16.mxu0 (!%p192_p9), %v1378_v7  ;;  %1422 = vmatpush3.bf16.msra.mxu1 (!%p192_p9), %v1382_v8  ;;  %v1398_v52 = vpack.c.bf16 (!%p192_p9), %v760_v51, %v759_v50  ;;  %v762_v54 = vld [vmem:[%s2056_s3 + $0x58] sm:$0xff] (!%p192_p9)  ;;  %v763_v56 = vld [vmem:[%s2056_s3 + $0x60] sm:$0xff] (!%p192_p9)  ;;  %v764_v57 = vld [vmem:[%s2056_s3 + $0x68] sm:$0xff] (!%p192_p9)  ;;  %s1539_s16 = sshll.u32 (!%p192_p9), %s1599_s15, 4  ;;  %s1540_s16 = int_to_ptr.vmem [resolvable:$false] %s1539_s16 }
  0x13   : > { %1415 = vmatprep.subr.bf16.mxu1 (!%p192_p9), %v1386_v11  ;;  %v1402_v55 = vpack.c.bf16 (!%p192_p9), %v762_v54, %v761_v53  ;;  %v1406_v58 = vpack.c.bf16 (!%p192_p9), %v764_v57, %v763_v56  ;;  %v765_v59 = vld [vmem:[%s2056_s3 + $0x70] sm:$0xff] (!%p192_p9)  ;;  %v766_v60 = vld [vmem:[%s2056_s3 + $0x78] sm:$0xff] (!%p192_p9)  ;;  %v1813_v62 = vld [vmem:[%s2055_s2] ss:$0 sm:$0xff] (!%p192_p9)  ;;  %s1541_s17 = scalar_lea.vmem (!%p192_p9), %s1540_s16, 8192  ;;  %p1542_p0 = scmp.lt.s32.totalorder (!%p192_p9), %s2005_s10, %s1540_s16 }
  0x14   : > { %v1410_v61 = vpack.c.bf16 (!%p192_p9), %v766_v60, %v765_v59 }
  0x15   : > { %s2066_s11 = smov (!%p220_p10, %s1112_s11), 63  ;;  %1381 = vmatpush3.bf16.msra.mxu0 %v1378_v7 }
  0x16   : > { %s1113_s6 = sshll.u32 %s2066_s11, 3  ;;  %1383 = vmatprep.subr.bf16.mxu0 %v1382_v8  ;;  %1423 = vmatpush3.bf16.msra.mxu1 %v1386_v11  ;;  %s1535_s11 = scalar_lea.vmem %s2005_s10, 4096 }
  0x17   : > { %s1714_s14 = scalar_lea.vmem %s2053_s0, %s1113_s6  ;;  %1416 = vmatprep.subr.bf16.mxu1 %v1390_v16  ;;  %p1536_p11 = scmp.ne.s32.totalorder %s2005_s10, %s1535_s11 }
  0x18   : > { %v226_v14 = vld [vmem:[%s1714_s14] sm:$0xff]  ;;  %v227_v15 = vld [vmem:[%s1714_s14 + $0x8] sm:$0xff]  ;;  %v228_v17 = vld [vmem:[%s1714_s14 + $0x10] sm:$0xff]  ;;  %p1543_p1 = scmp.lt.s32.totalorder %s1541_s17, %s1535_s11 }
  0x19   : > { %1246 = vmatprep.mubr.msk.f32.mxu0 %vm269_vm0, %v226_v14  ;;  %v229_v18 = vld [vmem:[%s1714_s14 + $0x18] sm:$0xff]  ;;  %v230_v19 = vld [vmem:[%s1714_s14 + $0x20] sm:$0xff]  ;;  %v231_v20 = vld [vmem:[%s1714_s14 + $0x28] sm:$0xff]  ;;  %p1537_p12 = pnand %p1536_p11, %p1670_p5 }
  0x1a   : > { %1247 = vmatmul.mubr.msk.f32.vlgmr.msra.gmra.mrb[0].mxu0 %vm269_vm0, %v227_v15  ;;  %1424 = vmatpush3.bf16.msra.mxu1 %v1390_v16  ;;  %v232_v21 = vld [vmem:[%s1714_s14 + $0x30] sm:$0xff]  ;;  %v233_v22 = vld [vmem:[%s1714_s14 + $0x38] sm:$0xff]  ;;  %v234_v23 = vld [vmem:[%s1714_s14 + $0x40] sm:$0xff]  ;;  %p1544_p2 = por %p1543_p1, %p1542_p0 }
  0x1b   : > { %1249 = vmatprep.mubr.msk.f32.mxu0 %vm269_vm0, %v228_v17  ;;  %1385 = vmatpush3.bf16.msra.mxu0 %v1382_v8  ;;  %v235_v24 = vld [vmem:[%s1714_s14 + $0x48] sm:$0xff]  ;;  %v236_v25 = vld [vmem:[%s1714_s14 + $0x50] sm:$0xff]  ;;  %v237_v26 = vld [vmem:[%s1714_s14 + $0x58] sm:$0xff]  ;;  %p1538_p13 = pneg %p1537_p12 }
  0x1c   : > { %1387 = vmatprep.subr.bf16.mxu0 %v1386_v11  ;;  %v238_v27 = vld [vmem:[%s1714_s14 + $0x60] sm:$0xff]  ;;  %v239_v28 = vld [vmem:[%s1714_s14 + $0x68] sm:$0xff]  ;;  %v240_v29 = vld [vmem:[%s1714_s14 + $0x70] sm:$0xff]  ;;  %1417 = vmatprep.subr.bf16.mxu1 %v1394_v49 }
  0x1d   : > { %v241_v30 = vld [vmem:[%s1714_s14 + $0x78] sm:$0xff]  ;;  %v242_v31 = vld [vmem:[%s1714_s14 + $0x80] sm:$0xff]  ;;  %v243_v32 = vld [vmem:[%s1714_s14 + $0x88] sm:$0xff]  ;;  %p1545_p3 = pnand %p1544_p2, %p1538_p13 }
  0x1e   : > { %1250 = vmatmul.mubr.msk.f32.gmra.mrb[2].mxu0 %vm269_vm0, %v229_v18  ;;  %v244_v33 = vld [vmem:[%s1714_s14 + $0x90] sm:$0xff]  ;;  %v245_v34 = vld [vmem:[%s1714_s14 + $0x98] sm:$0xff]  ;;  %v246_v35 = vld [vmem:[%s1714_s14 + $0xa0] sm:$0xff]  ;;  %1425 = vmatpush3.bf16.msra.mxu1 %v1394_v49 }
  0x1f   : > { %1252 = vmatprep.mubr.msk.f32.mxu0 %vm269_vm0, %v230_v19  ;;  %1389 = vmatpush3.bf16.msra.mxu0 %v1386_v11  ;;  %v247_v36 = vld [vmem:[%s1714_s14 + $0xa8] sm:$0xff]  ;;  %v248_v37 = vld [vmem:[%s1714_s14 + $0xb0] sm:$0xff]  ;;  %v249_v38 = vld [vmem:[%s1714_s14 + $0xb8] sm:$0xff] }
  0x20   : > { %1391 = vmatprep.subr.bf16.mxu0 %v1390_v16  ;;  %v250_v39 = vld [vmem:[%s1714_s14 + $0xc0] sm:$0xff]  ;;  %v251_v40 = vld [vmem:[%s1714_s14 + $0xc8] sm:$0xff]  ;;  %v252_v41 = vld [vmem:[%s1714_s14 + $0xd0] sm:$0xff]  ;;  %1418 = vmatprep.subr.bf16.mxu1 %v1398_v52 }
  0x21   : > { %v253_v42 = vld [vmem:[%s1714_s14 + $0xd8] sm:$0xff]  ;;  %v254_v43 = vld [vmem:[%s1714_s14 + $0xe0] sm:$0xff]  ;;  %v255_v44 = vld [vmem:[%s1714_s14 + $0xe8] sm:$0xff] }
  0x22   : > { %1253 = vmatmul.mubr.msk.f32.gmra.mrb[4].mxu0 %vm269_vm0, %v231_v20  ;;  %v256_v45 = vld [vmem:[%s1714_s14 + $0xf0] sm:$0xff]  ;;  %v257_v46 = vld [vmem:[%s1714_s14 + $0xf8] sm:$0xff]  ;;  %1426 = vmatpush3.bf16.msra.mxu1 %v1398_v52  ;;  %s2003_s14 = scalar_lea.hbm %s2058_s5, %s1153_s9 }
  0x23   : > { %1255 = vmatprep.mubr.msk.f32.mxu0 %vm269_vm0, %v232_v21  ;;  %1393 = vmatpush3.bf16.msra.mxu0 %v1390_v16 }
  0x24   : > { %1395 = vmatprep.subr.bf16.mxu0 %v1394_v49  ;;  %1419 = vmatprep.subr.bf16.mxu1 %v1402_v55 }
  0x26   : > { %1256 = vmatmul.mubr.msk.f32.gmra.mrb[6].mxu0 %vm269_vm0, %v233_v22  ;;  %1427 = vmatpush3.bf16.msra.mxu1 %v1402_v55 }
  0x27   : > { %1258 = vmatprep.mubr.msk.f32.mxu0 %vm269_vm0, %v234_v23  ;;  %1397 = vmatpush3.bf16.msra.mxu0 %v1394_v49 }
  0x28   : > { %1399 = vmatprep.subr.bf16.mxu0 %v1398_v52  ;;  %1420 = vmatprep.subr.bf16.mxu1 %v1406_v58 }
  0x2a   : > { %1259 = vmatmul.mubr.msk.f32.gmra.mrb[8].mxu0 %vm269_vm0, %v235_v24  ;;  %1428 = vmatpush3.bf16.msra.mxu1 %v1406_v58 }
  0x2b   : > { %1261 = vmatprep.mubr.msk.f32.mxu0 %vm269_vm0, %v236_v25  ;;  %1401 = vmatpush3.bf16.msra.mxu0 %v1398_v52 }
  0x2c   : > { %1403 = vmatprep.subr.bf16.mxu0 %v1402_v55  ;;  %1421 = vmatprep.subr.bf16.mxu1 %v1410_v61 }
  0x2e   : > { %1262 = vmatmul.mubr.msk.f32.gmra.mrb[10].mxu0 %vm269_vm0, %v237_v26  ;;  %1429 = vmatpush3.bf16.msra.mxu1 %v1410_v61 }
  0x2f   : > { %1264 = vmatprep.mubr.msk.f32.mxu0 %vm269_vm0, %v238_v27  ;;  %1405 = vmatpush3.bf16.msra.mxu0 %v1402_v55 }
  0x30   : > { %1407 = vmatprep.subr.bf16.mxu0 %v1406_v58 }
  0x32   : > { %1265 = vmatmul.mubr.msk.f32.gmra.mrb[12].mxu0 %vm269_vm0, %v239_v28 }
  0x33   : > { %1267 = vmatprep.mubr.msk.f32.mxu0 %vm269_vm0, %v240_v29  ;;  %1409 = vmatpush3.bf16.msra.mxu0 %v1406_v58 }
  0x34   : > { %1411 = vmatprep.subr.bf16.mxu0 %v1410_v61 }
  0x36   : > { %1268 = vmatmul.mubr.msk.f32.gmra.mrb[14].mxu0 %vm269_vm0, %v241_v30 }
  0x37   : > { %1270 = vmatprep.mubr.msk.f32.mxu0 %vm269_vm0, %v242_v31  ;;  %1413 = vmatpush3.bf16.msra.mxu0 %v1410_v61 }
  0x3a   : > { %1271 = vmatmul.mubr.msk.f32.gmra.mrb[16].mxu0 %vm269_vm0, %v243_v32 }
  0x3b   : > { %1273 = vmatprep.mubr.msk.f32.mxu0 %vm269_vm0, %v244_v33 }
  0x3e   : > { %1274 = vmatmul.mubr.msk.f32.gmra.mrb[18].mxu0 %vm269_vm0, %v245_v34 }
  0x3f   : > { %1276 = vmatprep.mubr.msk.f32.mxu0 %vm269_vm0, %v246_v35 }
  0x42   : > { %1277 = vmatmul.mubr.msk.f32.gmra.mrb[20].mxu0 %vm269_vm0, %v247_v36 }
  0x43   : > { %1279 = vmatprep.mubr.msk.f32.mxu0 %vm269_vm0, %v248_v37 }
  0x46   : > { %1280 = vmatmul.mubr.msk.f32.gmra.mrb[22].mxu0 %vm269_vm0, %v249_v38 }
  0x47   : > { %1282 = vmatprep.mubr.msk.f32.mxu0 %vm269_vm0, %v250_v39 }
  0x4a   : > { %1283 = vmatmul.mubr.msk.f32.gmra.mrb[24].mxu0 %vm269_vm0, %v251_v40 }
  0x4b   : > { %1285 = vmatprep.mubr.msk.f32.mxu0 %vm269_vm0, %v252_v41 }
  0x4e   : > { %1286 = vmatmul.mubr.msk.f32.gmra.mrb[26].mxu0 %vm269_vm0, %v253_v42 }
  0x4f   : > { %1288 = vmatprep.mubr.msk.f32.mxu0 %vm269_vm0, %v254_v43 }
  0x52   : > { %1289 = vmatmul.mubr.msk.f32.gmra.mrb[28].mxu0 %vm269_vm0, %v255_v44 }
  0x53   : > { %1291 = vmatprep.mubr.msk.f32.mxu0 %vm269_vm0, %v256_v45 }
  0x56   : > { %1292 = vmatmul.mubr.msk.f32.gmra.mrb[30].mxu0 %vm269_vm0, %v257_v46 }
  0xed   : > { %v1248_v63 = vpop.f32.mrb[0].mxu0 }
  0xee   : > { %v438_v0 = vadd.f32 %v1248_v63, %v1813_v62  ;;  %v432_v1 = vpop.f32.mrb[1].mxu0 }
  0xef   : > { %v433_v2 = vadd.f32 %v1813_v62, %v432_v1 }
  0xf0   : > { %v624_v3 = vmul.f32 0.70710677, %v438_v0  ;;  %v592_v31 = vmul.f32 0.5, %v438_v0 }
  0xf1   : > { %v623_v4 = vmul.f32 0.70710677, %v433_v2  ;;  %v1251_v5 = vpop.f32.mrb[2].mxu0  ;;  %v591_v27 = vmul.f32 0.5, %v433_v2 }
  0xf2   : > { %1471 = verf.f32 %v624_v3  ;;  %v448_v6 = vadd.f32 %v1251_v5, %v1813_v62  ;;  %v442_v7 = vpop.f32.mrb[3].mxu0 }
  0xf3   : > { %1473 = verf.f32 %v623_v4  ;;  %v443_v8 = vadd.f32 %v1813_v62, %v442_v7 }
  0xf4   : > { %v626_v9 = vmul.f32 0.70710677, %v448_v6  ;;  %v594_v45 = vmul.f32 0.5, %v448_v6 }
  0xf5   : > { %v625_v10 = vmul.f32 0.70710677, %v443_v8  ;;  %v1254_v11 = vpop.f32.mrb[4].mxu0  ;;  %v593_v41 = vmul.f32 0.5, %v443_v8 }
  0xf6   : > { %1475 = verf.f32 %v626_v9  ;;  %v458_v12 = vadd.f32 %v1254_v11, %v1813_v62  ;;  %v452_v13 = vpop.f32.mrb[5].mxu0 }
  0xf7   : > { %1477 = verf.f32 %v625_v10  ;;  %v453_v14 = vadd.f32 %v1813_v62, %v452_v13 }
  0xf8   : > { %v628_v15 = vmul.f32 0.70710677, %v458_v12  ;;  %v596_v59 = vmul.f32 0.5, %v458_v12 }
  0xf9   : > { %v627_v16 = vmul.f32 0.70710677, %v453_v14  ;;  %v1257_v17 = vpop.f32.mrb[6].mxu0  ;;  %v595_v55 = vmul.f32 0.5, %v453_v14 }
  0xfa   : > { %1479 = verf.f32 %v628_v15  ;;  %v1822_v18 = vadd.f32 %v1257_v17, %v1813_v62  ;;  %v462_v19 = vpop.f32.mrb[7].mxu0 }
  0xfb   : > { %1481 = verf.f32 %v627_v16  ;;  %v463_v20 = vadd.f32 %v1813_v62, %v462_v19 }
  0xfc   : > { %v1472_v21 = vpop.eup %1471  ;;  %v630_v22 = vmul.f32 0.70710677, %v1822_v18  ;;  %v598_v10 = vmul.f32 0.5, %v1822_v18 }
  0xfd   : > { %v1474_v23 = vpop.eup %1473  ;;  %v688_v24 = vadd.f32 1.0, %v1472_v21  ;;  %v629_v25 = vmul.f32 0.70710677, %v463_v20  ;;  %v1260_v26 = vpop.f32.mrb[8].mxu0  ;;  %v597_v8 = vmul.f32 0.5, %v463_v20 }
  0xfe   : > { %v687_v28 = vadd.f32 1.0, %v1474_v23  ;;  %1483 = verf.f32 %v630_v22  ;;  %v1827_v29 = vadd.f32 %v1260_v26, %v1813_v62  ;;  %v472_v30 = vpop.f32.mrb[9].mxu0 }
  0xff   : > { %1485 = verf.f32 %v629_v25  ;;  %v1830_v32 = vadd.f32 %v1813_v62, %v472_v30  ;;  %v720_v37 = vmul.f32 %v688_v24, %v592_v31 }
 0x100   : > { %v1476_v33 = vpop.eup %1475  ;;  %v632_v34 = vmul.f32 0.70710677, %v1827_v29  ;;  %v719_v35 = vmul.f32 %v687_v28, %v591_v27  ;;  %v600_v24 = vmul.f32 0.5, %v1827_v29 }
 0x101   : > { %v1478_v36 = vpop.eup %1477  ;;  %v690_v38 = vadd.f32 1.0, %v1476_v33  ;;  %v631_v39 = vmul.f32 0.70710677, %v1830_v32  ;;  %v1263_v40 = vpop.f32.mrb[10].mxu0  ;;  %v599_v20 = vmul.f32 0.5, %v1830_v32 }
 0x102   : > { %v689_v42 = vadd.f32 1.0, %v1478_v36  ;;  %1487 = verf.f32 %v632_v34  ;;  %v1835_v43 = vadd.f32 %v1263_v40, %v1813_v62  ;;  %v482_v44 = vpop.f32.mrb[11].mxu0  ;;  %1326 = vmatprep.mubr.f32.mxu0 %v719_v35 }
 0x103   : > { %1489 = verf.f32 %v631_v39  ;;  %v1838_v46 = vadd.f32 %v1813_v62, %v482_v44  ;;  %1327 = vmatmul.mubr.f32.vlgmr.msra.gmra.mrb[32].mxu0 %v720_v37  ;;  %v722_v54 = vmul.f32 %v690_v38, %v594_v45 }
 0x104   : > { %v1480_v47 = vpop.eup %1479  ;;  %v634_v48 = vmul.f32 0.70710677, %v1835_v43  ;;  %v721_v49 = vmul.f32 %v689_v42, %v593_v41  ;;  %v602_v38 = vmul.f32 0.5, %v1835_v43 }
 0x105   : > { %v1482_v50 = vpop.eup %1481  ;;  %v692_v51 = vadd.f32 1.0, %v1480_v47  ;;  %v633_v52 = vmul.f32 0.70710677, %v1838_v46  ;;  %v1266_v53 = vpop.f32.mrb[12].mxu0  ;;  %v601_v35 = vmul.f32 0.5, %v1838_v46 }
 0x106   : > { %v691_v56 = vadd.f32 1.0, %v1482_v50  ;;  %1491 = verf.f32 %v634_v48  ;;  %v1843_v57 = vadd.f32 %v1266_v53, %v1813_v62  ;;  %v492_v58 = vpop.f32.mrb[13].mxu0  ;;  %1329 = vmatprep.mubr.f32.mxu0 %v721_v49 }
 0x107   : > { %1493 = verf.f32 %v633_v52  ;;  %v1846_v60 = vadd.f32 %v1813_v62, %v492_v58  ;;  %1330 = vmatmul.mubr.f32.gmra.mrb[34].mxu0 %v722_v54  ;;  %v724_v5 = vmul.f32 %v692_v51, %v596_v59 }
 0x108   : > { %v1484_v61 = vpop.eup %1483  ;;  %v636_v63 = vmul.f32 0.70710677, %v1843_v57  ;;  %v723_v0 = vmul.f32 %v691_v56, %v595_v55  ;;  %v604_v52 = vmul.f32 0.5, %v1843_v57 }
 0x109   : > { %v1486_v1 = vpop.eup %1485  ;;  %v694_v2 = vadd.f32 1.0, %v1484_v61  ;;  %v635_v3 = vmul.f32 0.70710677, %v1846_v60  ;;  %v1269_v4 = vpop.f32.mrb[14].mxu0  ;;  %v603_v49 = vmul.f32 0.5, %v1846_v60 }
 0x10a   : > { %1495 = verf.f32 %v636_v63  ;;  %v1851_v6 = vadd.f32 %v1269_v4, %v1813_v62  ;;  %v502_v7 = vpop.f32.mrb[15].mxu0  ;;  %1332 = vmatprep.mubr.f32.mxu0 %v723_v0  ;;  %v693_v9 = vadd.f32 1.0, %v1486_v1 }
 0x10b   : > { %1497 = verf.f32 %v635_v3  ;;  %v1855_v11 = vadd.f32 %v1813_v62, %v502_v7  ;;  %1333 = vmatmul.mubr.f32.gmra.mrb[36].mxu0 %v724_v5  ;;  %v726_v21 = vmul.f32 %v694_v2, %v598_v10 }
 0x10c   : > { %v1488_v12 = vpop.eup %1487  ;;  %v638_v13 = vmul.f32 0.70710677, %v1851_v6  ;;  %v725_v14 = vmul.f32 %v693_v9, %v597_v8  ;;  %v606_v3 = vmul.f32 0.5, %v1851_v6 }
 0x10d   : > { %v1490_v15 = vpop.eup %1489  ;;  %v696_v16 = vadd.f32 1.0, %v1488_v12  ;;  %v637_v17 = vmul.f32 0.70710677, %v1855_v11  ;;  %v1272_v19 = vpop.f32.mrb[16].mxu0  ;;  %v605_v0 = vmul.f32 0.5, %v1855_v11 }
 0x10e   : > { %v695_v22 = vadd.f32 1.0, %v1490_v15  ;;  %1499 = verf.f32 %v638_v13  ;;  %v1861_v18 = vadd.f32 %v1272_v19, %v1813_v62  ;;  %v512_v23 = vpop.f32.mrb[17].mxu0  ;;  %1335 = vmatprep.mubr.f32.mxu1 %v725_v14 }
 0x10f   : > { %1501 = verf.f32 %v637_v17  ;;  %v1865_v25 = vadd.f32 %v1813_v62, %v512_v23  ;;  %1336 = vmatmul.mubr.f32.vlgmr.msra.gmra.mrb[0].mxu1 %v726_v21  ;;  %v728_v34 = vmul.f32 %v696_v16, %v600_v24 }
 0x110   : > { %v1492_v26 = vpop.eup %1491  ;;  %v640_v27 = vmul.f32 0.70710677, %v1861_v18  ;;  %v727_v28 = vmul.f32 %v695_v22, %v599_v20  ;;  %v608_v17 = vmul.f32 0.5, %v1861_v18 }
 0x111   : > { %v1494_v30 = vpop.eup %1493  ;;  %v698_v31 = vadd.f32 1.0, %v1492_v26  ;;  %v639_v32 = vmul.f32 0.70710677, %v1865_v25  ;;  %v1275_v33 = vpop.f32.mrb[18].mxu0  ;;  %v607_v14 = vmul.f32 0.5, %v1865_v25 }
 0x112   : > { %v697_v36 = vadd.f32 1.0, %v1494_v30  ;;  %1503 = verf.f32 %v640_v27  ;;  %v1871_v29 = vadd.f32 %v1275_v33, %v1813_v62  ;;  %v522_v37 = vpop.f32.mrb[19].mxu0  ;;  %1338 = vmatprep.mubr.f32.mxu1 %v727_v28 }
 0x113   : > { %1505 = verf.f32 %v639_v32  ;;  %v1875_v39 = vadd.f32 %v1813_v62, %v522_v37  ;;  %1339 = vmatmul.mubr.f32.gmra.mrb[2].mxu1 %v728_v34  ;;  %v730_v48 = vmul.f32 %v698_v31, %v602_v38 }
 0x114   : > { %v1496_v40 = vpop.eup %1495  ;;  %v642_v41 = vmul.f32 0.70710677, %v1871_v29  ;;  %v729_v42 = vmul.f32 %v697_v36, %v601_v35  ;;  %v610_v32 = vmul.f32 0.5, %v1871_v29 }
 0x115   : > { %v1498_v44 = vpop.eup %1497  ;;  %v700_v45 = vadd.f32 1.0, %v1496_v40  ;;  %v641_v46 = vmul.f32 0.70710677, %v1875_v39  ;;  %v1278_v47 = vpop.f32.mrb[20].mxu0  ;;  %v609_v28 = vmul.f32 0.5, %v1875_v39 }
 0x116   : > { %v699_v50 = vadd.f32 1.0, %v1498_v44  ;;  %1507 = verf.f32 %v642_v41  ;;  %v1881_v43 = vadd.f32 %v1278_v47, %v1813_v62  ;;  %v532_v51 = vpop.f32.mrb[21].mxu0  ;;  %1341 = vmatprep.mubr.f32.mxu1 %v729_v42 }
 0x117   : > { %1509 = verf.f32 %v641_v46  ;;  %v1885_v53 = vadd.f32 %v1813_v62, %v532_v51  ;;  %1342 = vmatmul.mubr.f32.gmra.mrb[4].mxu1 %v730_v48  ;;  %v732_v63 = vmul.f32 %v700_v45, %v604_v52 }
 0x118   : > { %v1500_v54 = vpop.eup %1499  ;;  %v644_v55 = vmul.f32 0.70710677, %v1881_v43  ;;  %v731_v56 = vmul.f32 %v699_v50, %v603_v49  ;;  %v612_v46 = vmul.f32 0.5, %v1881_v43 }
 0x119   : > { %v1502_v58 = vpop.eup %1501  ;;  %v702_v59 = vadd.f32 1.0, %v1500_v54  ;;  %v643_v60 = vmul.f32 0.70710677, %v1885_v53  ;;  %v1281_v61 = vpop.f32.mrb[22].mxu0  ;;  %v611_v42 = vmul.f32 0.5, %v1885_v53 }
 0x11a   : > { %v701_v1 = vadd.f32 1.0, %v1502_v58  ;;  %1511 = verf.f32 %v644_v55  ;;  %v1891_v57 = vadd.f32 %v1281_v61, %v1813_v62  ;;  %v542_v2 = vpop.f32.mrb[23].mxu0  ;;  %1344 = vmatprep.mubr.f32.mxu1 %v731_v56 }
 0x11b   : > { %1513 = verf.f32 %v643_v60  ;;  %v1895_v4 = vadd.f32 %v1813_v62, %v542_v2  ;;  %1345 = vmatmul.mubr.f32.gmra.mrb[6].mxu1 %v732_v63  ;;  %v734_v13 = vmul.f32 %v702_v59, %v606_v3 }
 0x11c   : > { %v1504_v5 = vpop.eup %1503  ;;  %v646_v7 = vmul.f32 0.70710677, %v1891_v57  ;;  %v733_v8 = vmul.f32 %v701_v1, %v605_v0  ;;  %v614_v43 = vmul.f32 0.5, %v1891_v57 }
 0x11d   : > { %v1506_v9 = vpop.eup %1505  ;;  %v704_v10 = vadd.f32 1.0, %v1504_v5  ;;  %v645_v11 = vmul.f32 0.70710677, %v1895_v4  ;;  %v1284_v12 = vpop.f32.mrb[24].mxu0  ;;  %v613_v56 = vmul.f32 0.5, %v1895_v4 }
 0x11e   : > { %v703_v15 = vadd.f32 1.0, %v1506_v9  ;;  %1515 = verf.f32 %v646_v7  ;;  %v1901_v6 = vadd.f32 %v1284_v12, %v1813_v62  ;;  %v552_v16 = vpop.f32.mrb[25].mxu0  ;;  %1347 = vmatprep.mubr.f32.mxu1 %v733_v8 }
 0x11f   : > { %1517 = verf.f32 %v645_v11  ;;  %v1905_v19 = vadd.f32 %v1813_v62, %v552_v16  ;;  %1348 = vmatmul.mubr.f32.gmra.mrb[8].mxu1 %v734_v13  ;;  %v736_v27 = vmul.f32 %v704_v10, %v608_v17 }
 0x120   : > { %v1508_v21 = vpop.eup %1507  ;;  %v648_v20 = vmul.f32 0.70710677, %v1901_v6  ;;  %v735_v22 = vmul.f32 %v703_v15, %v607_v14  ;;  %v616_v9 = vmul.f32 0.5, %v1901_v6 }
 0x121   : > { %v1510_v23 = vpop.eup %1509  ;;  %v706_v24 = vadd.f32 1.0, %v1508_v21  ;;  %v647_v25 = vmul.f32 0.70710677, %v1905_v19  ;;  %v1287_v26 = vpop.f32.mrb[26].mxu0  ;;  %v615_v4 = vmul.f32 0.5, %v1905_v19 }
 0x122   : > { %v705_v30 = vadd.f32 1.0, %v1510_v23  ;;  %1519 = verf.f32 %v648_v20  ;;  %v1911_v18 = vadd.f32 %v1287_v26, %v1813_v62  ;;  %v562_v31 = vpop.f32.mrb[27].mxu0  ;;  %1350 = vmatprep.mubr.f32.mxu1 %v735_v22 }
 0x123   : > { %1521 = verf.f32 %v647_v25  ;;  %v563_v33 = vadd.f32 %v1813_v62, %v562_v31  ;;  %1351 = vmatmul.mubr.f32.gmra.mrb[10].mxu1 %v736_v27  ;;  %v738_v41 = vmul.f32 %v706_v24, %v610_v32 }
 0x124   : > { %v1512_v34 = vpop.eup %1511  ;;  %v650_v35 = vmul.f32 0.70710677, %v1911_v18  ;;  %v737_v36 = vmul.f32 %v705_v30, %v609_v28  ;;  %v618_v15 = vmul.f32 0.5, %v1911_v18 }
 0x125   : > { %v1514_v37 = vpop.eup %1513  ;;  %v708_v38 = vadd.f32 1.0, %v1512_v34  ;;  %v649_v39 = vmul.f32 0.70710677, %v563_v33  ;;  %v1290_v40 = vpop.f32.mrb[28].mxu0  ;;  %v617_v13 = vmul.f32 0.5, %v563_v33 }
 0x126   : > { %v707_v44 = vadd.f32 1.0, %v1514_v37  ;;  %1523 = verf.f32 %v650_v35  ;;  %v578_v45 = vadd.f32 %v1290_v40, %v1813_v62  ;;  %v572_v29 = vpop.f32.mrb[29].mxu0  ;;  %1353 = vmatprep.mubr.f32.mxu1 %v737_v36  ;;  %v1933_v34 = vld [vmem:[%s2057_s4] ss:$0 sm:$0xff] }
 0x127   : > { %1525 = verf.f32 %v649_v39  ;;  %v573_v47 = vadd.f32 %v1813_v62, %v572_v29  ;;  %1354 = vmatmul.mubr.f32.gmra.mrb[12].mxu1 %v738_v41  ;;  %v740_v53 = vmul.f32 %v708_v38, %v612_v46 }
 0x128   : > { %v1516_v48 = vpop.eup %1515  ;;  %v652_v49 = vmul.f32 0.70710677, %v578_v45  ;;  %v739_v50 = vmul.f32 %v707_v44, %v611_v42  ;;  %v620_v23 = vmul.f32 0.5, %v578_v45 }
 0x129   : > { %v1518_v51 = vpop.eup %1517  ;;  %v710_v52 = vadd.f32 1.0, %v1516_v48  ;;  %v651_v54 = vmul.f32 0.70710677, %v573_v47  ;;  %v1293_v55 = vpop.f32.mrb[30].mxu0  ;;  %v619_v22 = vmul.f32 0.5, %v573_v47 }
 0x12a   : > { %v709_v58 = vadd.f32 1.0, %v1518_v51  ;;  %1527 = verf.f32 %v652_v49  ;;  %v588_v59 = vadd.f32 %v1293_v55, %v1813_v62  ;;  %v582_v60 = vpop.f32.mrb[31].mxu0  ;;  %1356 = vmatprep.mubr.f32.mxu1 %v739_v50 }
 0x12b   : > { %1529 = verf.f32 %v651_v54  ;;  %v583_v61 = vadd.f32 %v1813_v62, %v582_v60  ;;  %1357 = vmatmul.mubr.f32.gmra.mrb[14].mxu1 %v740_v53  ;;  %v742_v7 = vmul.f32 %v710_v52, %v614_v43 }
 0x12c   : > { %v1520_v63 = vpop.eup %1519  ;;  %v654_v0 = vmul.f32 0.70710677, %v588_v59  ;;  %v741_v1 = vmul.f32 %v709_v58, %v613_v56  ;;  %v622_v31 = vmul.f32 0.5, %v588_v59 }
 0x12d   : > { %v1522_v2 = vpop.eup %1521  ;;  %v712_v3 = vadd.f32 1.0, %v1520_v63  ;;  %v653_v5 = vmul.f32 0.70710677, %v583_v61  ;;  %v621_v30 = vmul.f32 0.5, %v583_v61 }
 0x12e   : > { %v711_v8 = vadd.f32 1.0, %v1522_v2  ;;  %1531 = verf.f32 %v654_v0  ;;  %1359 = vmatprep.mubr.f32.mxu1 %v741_v1 }
 0x12f   : > { %1533 = verf.f32 %v653_v5  ;;  %1360 = vmatmul.mubr.f32.gmra.mrb[16].mxu1 %v742_v7  ;;  %v744_v12 = vmul.f32 %v712_v3, %v616_v9 }
 0x130   : > { %v1524_v57 = vpop.eup %1523  ;;  %v743_v10 = vmul.f32 %v711_v8, %v615_v4 }
 0x131   : > { %v1526_v62 = vpop.eup %1525  ;;  %v714_v11 = vadd.f32 1.0, %v1524_v57 }
 0x132   : > { %v713_v14 = vadd.f32 1.0, %v1526_v62  ;;  %1362 = vmatprep.mubr.f32.mxu1 %v743_v10 }
 0x133   : > { %1363 = vmatmul.mubr.f32.gmra.mrb[18].mxu1 %v744_v12  ;;  %v746_v20 = vmul.f32 %v714_v11, %v618_v15 }
 0x134   : > { %v1528_v16 = vpop.eup %1527  ;;  %v745_v17 = vmul.f32 %v713_v14, %v617_v13 }
 0x135   : > { %v1530_v19 = vpop.eup %1529  ;;  %v716_v21 = vadd.f32 1.0, %v1528_v16 }
 0x136   : > { %v715_v6 = vadd.f32 1.0, %v1530_v19  ;;  %1365 = vmatprep.mubr.f32.mxu1 %v745_v17 }
 0x137   : > { %1366 = vmatmul.mubr.f32.gmra.mrb[20].mxu1 %v746_v20  ;;  %v748_v28 = vmul.f32 %v716_v21, %v620_v23 }
 0x138   : > { %v1532_v24 = vpop.eup %1531  ;;  %v747_v25 = vmul.f32 %v715_v6, %v619_v22 }
 0x139   : > { %v1534_v26 = vpop.eup %1533  ;;  %v718_v27 = vadd.f32 1.0, %v1532_v24 }
 0x13a   : > { %v717_v18 = vadd.f32 1.0, %v1534_v26  ;;  %1368 = vmatprep.mubr.f32.mxu1 %v747_v25 }
 0x13b   : > { %1369 = vmatmul.mubr.f32.gmra.mrb[22].mxu1 %v748_v28  ;;  %v750_v33 = vmul.f32 %v718_v27, %v622_v31 }
 0x13c   : > { %v749_v32 = vmul.f32 %v717_v18, %v621_v30 }
 0x13e   : > { %1371 = vmatprep.mubr.f32.mxu1 %v749_v32 }
 0x13f   : > { %1372 = vmatmul.mubr.f32.gmra.mrb[24].mxu1 %v750_v33 }
 0x1d6   : > { %v1328_v35 = vpop.f32.mrb[32].mxu0 }
 0x1d7   : > { %v846_v36 = vadd.f32 %v1328_v35, %v1933_v34  ;;  %v840_v37 = vpop.f32.mrb[33].mxu0 }
 0x1d8   : > { %v841_v38 = vadd.f32 %v1933_v34, %v840_v37 }
 0x1d9   : > { %1000 = vst [vmem:[%s1937_s8 + $0x8] sm:$0xff] %v846_v36 }
 0x1da   : > { %999 = vst [vmem:[%s1937_s8] sm:$0xff] %v841_v38  ;;  %v1331_v39 = vpop.f32.mrb[34].mxu0 }
 0x1db   : > { %v856_v40 = vadd.f32 %v1331_v39, %v1933_v34  ;;  %v850_v41 = vpop.f32.mrb[35].mxu0 }
 0x1dc   : > { %v851_v42 = vadd.f32 %v1933_v34, %v850_v41 }
 0x1dd   : > { %1002 = vst [vmem:[%s1937_s8 + $0x18] sm:$0xff] %v856_v40 }
 0x1de   : > { %1001 = vst [vmem:[%s1937_s8 + $0x10] sm:$0xff] %v851_v42  ;;  %v1334_v44 = vpop.f32.mrb[36].mxu0 }
 0x1df   : > { %v866_v45 = vadd.f32 %v1334_v44, %v1933_v34  ;;  %v860_v29 = vpop.f32.mrb[37].mxu0 }
 0x1e0   : > { %v861_v46 = vadd.f32 %v1933_v34, %v860_v29 }
 0x1e1   : > { %1004 = vst [vmem:[%s1937_s8 + $0x28] sm:$0xff] %v866_v45 }
 0x1e2   : > { %1003 = vst [vmem:[%s1937_s8 + $0x20] sm:$0xff] %v861_v46  ;;  %v1337_v47 = vpop.f32.mrb[0].mxu1 }
 0x1e3   : > { %v876_v48 = vadd.f32 %v1337_v47, %v1933_v34  ;;  %v870_v49 = vpop.f32.mrb[1].mxu1 }
 0x1e4   : > { %v871_v50 = vadd.f32 %v1933_v34, %v870_v49 }
 0x1e5   : > { %1006 = vst [vmem:[%s1937_s8 + $0x38] sm:$0xff] %v876_v48 }
 0x1e6   : > { %1005 = vst [vmem:[%s1937_s8 + $0x30] sm:$0xff] %v871_v50  ;;  %v1340_v51 = vpop.f32.mrb[2].mxu1 }
 0x1e7   : > { %v886_v52 = vadd.f32 %v1340_v51, %v1933_v34  ;;  %v880_v54 = vpop.f32.mrb[3].mxu1 }
 0x1e8   : > { %v881_v55 = vadd.f32 %v1933_v34, %v880_v54 }
 0x1e9   : > { %1008 = vst [vmem:[%s1937_s8 + $0x48] sm:$0xff] %v886_v52 }
 0x1ea   : > { %1007 = vst [vmem:[%s1937_s8 + $0x40] sm:$0xff] %v881_v55  ;;  %v1343_v53 = vpop.f32.mrb[4].mxu1 }
 0x1eb   : > { %v896_v56 = vadd.f32 %v1343_v53, %v1933_v34  ;;  %v890_v58 = vpop.f32.mrb[5].mxu1 }
 0x1ec   : > { %v891_v59 = vadd.f32 %v1933_v34, %v890_v58 }
 0x1ed   : > { %1010 = vst [vmem:[%s1937_s8 + $0x58] sm:$0xff] %v896_v56 }
 0x1ee   : > { %1009 = vst [vmem:[%s1937_s8 + $0x50] sm:$0xff] %v891_v59  ;;  %v1346_v60 = vpop.f32.mrb[6].mxu1 }
 0x1ef   : > { %v906_v43 = vadd.f32 %v1346_v60, %v1933_v34  ;;  %v900_v61 = vpop.f32.mrb[7].mxu1 }
 0x1f0   : > { %v901_v63 = vadd.f32 %v1933_v34, %v900_v61 }
 0x1f1   : > { %1012 = vst [vmem:[%s1937_s8 + $0x68] sm:$0xff] %v906_v43 }
 0x1f2   : > { %1011 = vst [vmem:[%s1937_s8 + $0x60] sm:$0xff] %v901_v63  ;;  %v1349_v0 = vpop.f32.mrb[8].mxu1 }
 0x1f3   : > { %v916_v1 = vadd.f32 %v1349_v0, %v1933_v34  ;;  %v910_v2 = vpop.f32.mrb[9].mxu1 }
 0x1f4   : > { %v911_v3 = vadd.f32 %v1933_v34, %v910_v2 }
 0x1f5   : > { %1014 = vst [vmem:[%s1937_s8 + $0x78] sm:$0xff] %v916_v1 }
 0x1f6   : > { %1013 = vst [vmem:[%s1937_s8 + $0x70] sm:$0xff] %v911_v3  ;;  %v1352_v5 = vpop.f32.mrb[10].mxu1 }
 0x1f7   : > { %v926_v7 = vadd.f32 %v1352_v5, %v1933_v34  ;;  %v920_v4 = vpop.f32.mrb[11].mxu1 }
 0x1f8   : > { %v921_v8 = vadd.f32 %v1933_v34, %v920_v4 }
 0x1f9   : > { %1016 = vst [vmem:[%s1937_s8 + $0x88] sm:$0xff] %v926_v7 }
 0x1fa   : > { %1015 = vst [vmem:[%s1937_s8 + $0x80] sm:$0xff] %v921_v8  ;;  %v1355_v9 = vpop.f32.mrb[12].mxu1 }
 0x1fb   : > { %v936_v57 = vadd.f32 %v1355_v9, %v1933_v34  ;;  %v930_v10 = vpop.f32.mrb[13].mxu1 }
 0x1fc   : > { %v931_v62 = vadd.f32 %v1933_v34, %v930_v10 }
 0x1fd   : > { %1018 = vst [vmem:[%s1937_s8 + $0x98] sm:$0xff] %v936_v57 }
 0x1fe   : > { %1017 = vst [vmem:[%s1937_s8 + $0x90] sm:$0xff] %v931_v62  ;;  %v1358_v11 = vpop.f32.mrb[14].mxu1 }
 0x1ff   : > { %v946_v12 = vadd.f32 %v1358_v11, %v1933_v34  ;;  %v940_v13 = vpop.f32.mrb[15].mxu1 }
 0x200   : > { %v941_v14 = vadd.f32 %v1933_v34, %v940_v13 }
 0x201   : > { %1020 = vst [vmem:[%s1937_s8 + $0xa8] sm:$0xff] %v946_v12 }
 0x202   : > { %1019 = vst [vmem:[%s1937_s8 + $0xa0] sm:$0xff] %v941_v14  ;;  %v1361_v15 = vpop.f32.mrb[16].mxu1 }
 0x203   : > { %v956_v16 = vadd.f32 %v1361_v15, %v1933_v34  ;;  %v950_v17 = vpop.f32.mrb[17].mxu1 }
 0x204   : > { %v951_v19 = vadd.f32 %v1933_v34, %v950_v17 }
 0x205   : > { %1022 = vst [vmem:[%s1937_s8 + $0xb8] sm:$0xff] %v956_v16 }
 0x206   : > { %1021 = vst [vmem:[%s1937_s8 + $0xb0] sm:$0xff] %v951_v19  ;;  %v1364_v21 = vpop.f32.mrb[18].mxu1 }
 0x207   : > { %v966_v20 = vadd.f32 %v1364_v21, %v1933_v34  ;;  %v960_v22 = vpop.f32.mrb[19].mxu1 }
 0x208   : > { %v961_v6 = vadd.f32 %v1933_v34, %v960_v22 }
 0x209   : > { %1024 = vst [vmem:[%s1937_s8 + $0xc8] sm:$0xff] %v966_v20 }
 0x20a   : > { %1023 = vst [vmem:[%s1937_s8 + $0xc0] sm:$0xff] %v961_v6  ;;  %v1367_v23 = vpop.f32.mrb[20].mxu1 }
 0x20b   : > { %v976_v24 = vadd.f32 %v1367_v23, %v1933_v34  ;;  %v970_v25 = vpop.f32.mrb[21].mxu1 }
 0x20c   : > { %v971_v26 = vadd.f32 %v1933_v34, %v970_v25 }
 0x20d   : > { %1026 = vst [vmem:[%s1937_s8 + $0xd8] sm:$0xff] %v976_v24 }
 0x20e   : > { %1025 = vst [vmem:[%s1937_s8 + $0xd0] sm:$0xff] %v971_v26  ;;  %v1370_v27 = vpop.f32.mrb[22].mxu1 }
 0x20f   : > { %v986_v28 = vadd.f32 %v1370_v27, %v1933_v34  ;;  %v980_v30 = vpop.f32.mrb[23].mxu1 }
 0x210   : > { %v981_v18 = vadd.f32 %v1933_v34, %v980_v30 }
 0x211   : > { %1028 = vst [vmem:[%s1937_s8 + $0xe8] sm:$0xff] %v986_v28 }
 0x212   : > { %1027 = vst [vmem:[%s1937_s8 + $0xe0] sm:$0xff] %v981_v18  ;;  %v1373_v31 = vpop.f32.mrb[24].mxu1 }
 0x213   : > { %v996_v32 = vadd.f32 %v1373_v31, %v1933_v34  ;;  %v990_v33 = vpop.f32.mrb[25].mxu1 }
 0x214   : > { %v991_v35 = vadd.f32 %v1933_v34, %v990_v33 }
 0x215   : > { %1030 = vst [vmem:[%s1937_s8 + $0xf8] sm:$0xff] %v996_v32 }
 0x216   : > { %1029 = vst [vmem:[%s1937_s8 + $0xf0] sm:$0xff] %v991_v35 }
 0x217   : > { %1548 = shalt.err (!%p1545_p3)
}
 0x218   : > { %s1549_s23 = scalar_lea.hbm %s2003_s14, 4096  ;;  %s1553_s30 = scalar_lea.hbm %s2058_s5, 8192 }
 0x219   : > { %p1550_p4 = scmp.ne.s32.totalorder %s2003_s14, %s1549_s23  ;;  %p1554_p9 = scmp.lt.u32.totalorder %s2003_s14, %s2058_s5 }
 0x21a   : > { %p1555_p10 = scmp.lt.u32.totalorder %s1553_s30, %s1549_s23  ;;  %p1557_p12 = scmp.lt.u32.totalorder %s1549_s23, %s2003_s14 }
 0x21b   : > { %p1551_p7 = pnand %p1550_p4, %p1670_p5 }
 0x21c   : > { %p1556_p11 = por %p1555_p10, %p1554_p9 }
 0x21d   : > { %p1552_p8 = pneg %p1551_p7 }
 0x21e   : > { %p1558_p13 = por %p1557_p12, %p1556_p11 }
 0x220   : > { %p1559_p0 = pnand %p1558_p13, %p1552_p8 }
 0x222   : > { %1562 = shalt.err (!%p1559_p0)
}
 0x223   : > { %s1600_s8 = smov 128   ;;  %s1601_s9 = smov 8  }
 0x224   : > { %1430 = dma.vmem_to_hbm [thread:$0]  (%p1670_p5), %s2005_s10, 4096, %s2003_s14, %s2012_s22, %s1600_s8, %s1600_s8, %s1601_s9  }
 0x225 PF: > { %p1436_p1 = scmp.ge.s32.totalorder %s1597_s21, 2  ;;  %s1060_s12 = sand.u32 1, %s1585_s18  }
 0x226   : > { %s1061_s13 = scalar_lea.sflag [#allocation3], %s1060_s12 }
 0x227   : > { %p1433_p2 = pnand %p1436_p1, %p1674_p6 }
 0x229   : > { %1580 = dma.done.wait (!%p1433_p2), %s1061_s13, 4096  }
 0x22a   : > { %1582 = vsyncadd (!%p1433_p2), %s1061_s13, 4294963200  ;;  %p15_p3 = scmp.ge.s32.totalorder %s1657_s24, 4   ;;  %s2061_s18 = smov %s1589_s19 }
 0x22b   : > { %s2062_s19 = smov %s1593_s20  ;;  %s2063_s20 = smov %s1668_s27 }
 0x22c   : > { %s2064_s21 = smov %s1657_s24  ;;  %17 = sbr.rel (!%p15_p3) target bundleno = 3 (0x3), region = 75 }
 0x233   :  { %1066 = vsyncpa [#allocation3], 1 }
 0x234   :  { %1068 = vsyncpa [#allocation3 + $0x1], 1 }

</bundles_post_ra>
